<compile_context>
chip_gen: v7x
topology: tpu7x:2x2x1
jax: 0.10.0
libtpu: 0.0.40
codegen_flags: <defaults>
</compile_context>

<pallas_src>
import numpy as np
import jax
import jax.numpy as jnp
from jax.experimental import pallas as pl
from jax.experimental.pallas import tpu as pltpu


def _choose_tile(N, W, H, pipe_bytes_per_col, *, max_lanes=2048,
                 budget_bytes=24 << 20):
    """Pick the pixel-tile width tn (static).

    Constraints:
      * tn divides N and is a multiple of H  (tile boundaries align with image
        rows, so TV masks are tile-local and the stride-H carry is exact),
      * tn is lane-dense (multiple of 128) or covers the whole pixel axis,
      * tn != 2*H and tn != 2  (no wrap-around aliasing in the roll-based masks).
    Preference: the largest tile whose double-buffered pipeline footprint fits
    the VMEM budget and max_lanes; otherwise the smallest valid tile.
    """
    cands = []
    for d in range(1, W + 1):
        if W % d:
            continue
        t = d * H
        if t == 2 * H or t == 2:
            continue
        if t % 128 != 0 and t != N:
            continue
        cands.append(t)
    if not cands:
        raise ValueError(
            f"No supported pixel tile for N={N}, H={H}; pad N (ideally to a "
            f"multiple of lcm(128, H)) before calling the kernel.")
    good = [t for t in cands
            if t <= max_lanes and t * pipe_bytes_per_col <= budget_bytes]
    return max(good) if good else min(cands)


def _make_kernel(M, H, tn):
    """Kernel over grid (N // tn,).  Refs:
       x_0..x_{M-1}, a_0..a_{M-1}, z, row_local, out, carry."""

    def kernel(*refs):
        x_refs = refs[:M]
        a_refs = refs[M:2 * M]
        z_ref = refs[2 * M]
        row_ref = refs[2 * M + 1]
        out_ref = refs[2 * M + 2]          # SMEM (1, M+1): E_0..E_{M-1}, TV
        carry_ref = refs[2 * M + 3]        # VMEM (K, H)

        n = pl.program_id(0)

        @pl.when(n == 0)
        def _init():
            for j in range(M + 1):
                out_ref[0, j] = jnp.float32(0.0)

        z = z_ref[...].astype(jnp.float32)                     # (K, tn)

        # ---- per-modality reconstruction energies on this pixel tile --------
        for m in range(M):
            x = x_refs[m][...].astype(jnp.float32)             # (D_m, tn)
            az = jnp.dot(a_refs[m][...], z,
                         preferred_element_type=jnp.float32)
            r = x - az
            out_ref[0, m] += jnp.sum(r * r)

        # ---- TV on this Z tile (flat index i = w*H + h, h fastest) ----------
        # Masks are derived from rolled index/row vectors, so they are valid
        # for either rotation convention of pltpu.roll.
        lane = jax.lax.broadcasted_iota(jnp.int32, z.shape, 1)
        row = jnp.broadcast_to(row_ref[...], z.shape)          # local j // H

        src1 = pltpu.roll(lane, 1, axis=1)
        row1 = pltpu.roll(row, 1, axis=1)
        d1 = z - pltpu.roll(z, 1, axis=1)                      # along H (fast axis)
        m1 = (jnp.abs(lane - src1) == 1) & (row == row1)
        tv = jnp.sum(jnp.where(m1, d1 * d1, 0.0))

        if tn > H:                                             # static
            srcH = pltpu.roll(lane, H, axis=1)
            rowH = pltpu.roll(row, H, axis=1)
            dH = z - pltpu.roll(z, H, axis=1)                  # along W (slow axis)
            mH = (jnp.abs(lane - srcH) == H) & (jnp.abs(row - rowH) == 1)
            tv = tv + jnp.sum(jnp.where(mH, dH * dH, 0.0))

        out_ref[0, M] += tv

        # Stride-H pairs straddling the tile boundary, via the carry of the
        # previous tile's trailing image row ("arbitrary" grid => sequential).
        @pl.when(n > 0)
        def _boundary():
            db = carry_ref[...] - z[:, :H]
            out_ref[0, M] += jnp.sum(db * db)

        carry_ref[...] = z[:, tn - H:]

    return kernel


def net_forward(x_list, anchors, modality_weights, Z, *, spatial_size,
                num_anchor, smooth_coef=1.2, lambda_tv=1.0, max_lanes=2048):
    W, H = spatial_size
    N = W * H
    K = num_anchor
    M = len(x_list)
    assert M >= 1 and len(anchors) == M and len(modality_weights) == M
    assert Z.shape == (K, N)

    d_list = [int(x.shape[0]) for x in x_list]
    x_bytes_col = sum(d * jnp.dtype(x.dtype).itemsize
                      for d, x in zip(d_list, x_list))
    z_bytes_col = K * jnp.dtype(Z.dtype).itemsize
    tn = _choose_tile(N, W, H, 2 * (x_bytes_col + z_bytes_col),
                      max_lanes=max_lanes)
    grid = (N // tn,)

    # Tile-local pixel-row index (j // H).  Identical for every tile because
    # tn % H == 0, so its constant block index is fetched once.
    row_local = jnp.asarray((np.arange(tn, dtype=np.int32) // H).reshape(1, tn))

    anchors32 = [jnp.asarray(a, jnp.float32) for a in anchors]

    in_specs = (
        [pl.BlockSpec((d, tn), lambda n: (0, n)) for d in d_list]   # X_m streamed
        + [pl.BlockSpec((d, K), lambda n: (0, 0)) for d in d_list]  # A_m (tiny, resident)
        + [pl.BlockSpec((K, tn), lambda n: (0, n)),                 # Z streamed
           pl.BlockSpec((1, tn), lambda n: (0, 0))])                # row_local

    # VMEM budget: double-buffered streams + tiny residents + carry.
    est = (2 * tn * (x_bytes_col + z_bytes_col)
           + 2 * sum(d * K * 4 for d in d_list)
           + 2 * tn * 4 + K * H * 4)
    vmem_limit = int(min(64 << 20, max(32 << 20, 2 * est)))

    flops = int(sum(2 * d * K * N + 3 * d * N for d in d_list) + 14 * K * N)
    bytes_accessed = int(
        sum(d * N * jnp.dtype(x.dtype).itemsize for d, x in zip(d_list, x_list))
        + K * N * jnp.dtype(Z.dtype).itemsize
        + sum(d * K * 4 for d in d_list) + 4 * tn + 4 * (M + 1))

    parts = pl.pallas_call(
        _make_kernel(M, H, tn),
        out_shape=jax.ShapeDtypeStruct((1, M + 1), jnp.float32),
        grid=grid,
        in_specs=in_specs,
        out_specs=pl.BlockSpec((1, M + 1), lambda n: (0, 0),
                               memory_space=pltpu.SMEM),
        scratch_shapes=[pltpu.VMEM((K, H), jnp.float32)],
        compiler_params=pltpu.CompilerParams(
            dimension_semantics=("arbitrary",),
            vmem_limit_bytes=vmem_limit),
        cost_estimate=pl.CostEstimate(flops=flops, transcendentals=0,
                                      bytes_accessed=bytes_accessed),
    )(*x_list, *anchors32, Z, row_local)

    # O(M) scalar combine: 0.5 * mu**p per modality + 0.5 * lambda_tv * TV.
    loss = jnp.float32(0.0)
    for m, mu in enumerate(modality_weights):
        w = jnp.asarray(mu, jnp.float32) ** smooth_coef
        loss = loss + 0.5 * w * parts[0, m]
    return loss + jnp.float32(0.5 * lambda_tv) * parts[0, M]


def xavier_uniform(key, shape, gain=1.0, dtype=jnp.float32):
    fan_out, fan_in = shape  # PyTorch 2-D convention
    bound = gain * float(np.sqrt(6.0 / (fan_in + fan_out)))
    return jax.random.uniform(key, shape, dtype=dtype, minval=-bound, maxval=bound)


if __name__ == "__main__":
    # small shapes consistent with the module
    spatial_size = (16, 16)          # (W, H) -> n_samples = 256
    num_anchor = 8
    n_samples = spatial_size[0] * spatial_size[1]
    d_feats = [32, 32]               # feature dims of the two modalities
    smooth_coef = 1.2
    lambda_tv = 1.0

    key = jax.random.PRNGKey(0)
    kz, k0, k1, k2, k3 = jax.random.split(key, 5)

    Z = xavier_uniform(kz, (num_anchor, n_samples))
    anchors = [
        jax.random.normal(k0, (d_feats[0], num_anchor), jnp.float32),
        jax.random.normal(k1, (d_feats[1], num_anchor), jnp.float32),
    ]
    x_list = [
        jax.random.normal(k2, (d_feats[0], n_samples), jnp.float32),
        jax.random.normal(k3, (d_feats[1], n_samples), jnp.float32),
    ]
    modality_weights = [jnp.float32(0.7), jnp.float32(0.3)]

    # pure-JAX reference
    ref = jnp.float32(0.0)
    for a_, x_, mu_ in zip(anchors, x_list, modality_weights):
        r = x_ - a_ @ Z
        ref = ref + 0.5 * jnp.sum(r * r) * (mu_ ** smooth_coef)
    zi = Z.reshape(num_anchor, *spatial_size)
    ref = ref + 0.5 * lambda_tv * (
        jnp.sum((zi[:, :-1, :] - zi[:, 1:, :]) ** 2)
        + jnp.sum((zi[:, :, :-1] - zi[:, :, 1:]) ** 2))

    fwd = jax.jit(net_forward, static_argnames=("spatial_size", "num_anchor",
                                                "smooth_coef", "lambda_tv",
                                                "max_lanes"))

    # default tiling (single 256-lane tile at this size)
    loss = jax.block_until_ready(
        fwd(x_list, anchors, modality_weights, Z, spatial_size=spatial_size,
            num_anchor=num_anchor, smooth_coef=smooth_coef, lambda_tv=lambda_tv))
    assert jnp.allclose(loss, ref, rtol=5e-5, atol=1e-3), (loss, ref)

    # forced multi-tile run (exercises the streamed-Z path and the TV carry)
    loss2 = jax.block_until_ready(
        fwd(x_list, anchors, modality_weights, Z, spatial_size=spatial_size,
            num_anchor=num_anchor, smooth_coef=smooth_coef, lambda_tv=lambda_tv,
            max_lanes=128))
    assert jnp.allclose(loss2, ref, rtol=5e-5, atol=1e-3), (loss2, ref)

    print("KERNEL_OK")
</pallas_src>

<mosaic_0001>
module attributes {stable_mosaic.version = 11 : i64} {
  func.func @kernel(%arg0: i32, %arg1: memref<32x256xf32, #tpu.memory_space<vmem>>, %arg2: memref<32x256xf32, #tpu.memory_space<vmem>>, %arg3: memref<32x8xf32, #tpu.memory_space<vmem>>, %arg4: memref<32x8xf32, #tpu.memory_space<vmem>>, %arg5: memref<8x256xf32, #tpu.memory_space<vmem>>, %arg6: memref<1x256xi32, #tpu.memory_space<vmem>>, %arg7: memref<1x3xf32, #tpu.memory_space<smem>>, %arg8: memref<8x16xf32, #tpu.memory_space<vmem>>) attributes {dimension_semantics = [#tpu.dimension_semantics<arbitrary>], iteration_bounds = array<i64: 1>, scalar_prefetch = 0 : i64, scratch_operands = 1 : i64, tpu.core_type = #tpu.core_type<tc>, window_params = [{transform_indices = @transform_0, window_bounds = array<i64: 32, 256>}, {transform_indices = @transform_1, window_bounds = array<i64: 32, 256>}, {pipeline_mode = #tpu.pipeline_mode<synchronous>, transform_indices = @transform_2, window_bounds = array<i64: 32, 8>}, {pipeline_mode = #tpu.pipeline_mode<synchronous>, transform_indices = @transform_3, window_bounds = array<i64: 32, 8>}, {transform_indices = @transform_4, window_bounds = array<i64: 8, 256>}, {pipeline_mode = #tpu.pipeline_mode<synchronous>, transform_indices = @transform_5, window_bounds = array<i64: 1, 256>}, {transform_indices = @transform_6, window_bounds = array<i64: 1, 3>}]} {
    %c0_i32 = arith.constant 0 : i32
    %0 = arith.cmpi eq, %arg0, %c0_i32 : i32
    %1 = arith.extui %0 : i1 to i32
    %c0_i32_0 = arith.constant 0 : i32
    %2 = arith.cmpi ne, %1, %c0_i32_0 : i32
    scf.if %2 {
      %cst_40 = arith.constant 0.000000e+00 : f32
      %c0_41 = arith.constant 0 : index
      %c0_42 = arith.constant 0 : index
      %78 = memref.load %arg7[%c0_41, %c0_42] : memref<1x3xf32, #tpu.memory_space<smem>>
      memref.store %cst_40, %arg7[%c0_41, %c0_42] : memref<1x3xf32, #tpu.memory_space<smem>>
      %cst_43 = arith.constant 0.000000e+00 : f32
      %c0_44 = arith.constant 0 : index
      %c1_45 = arith.constant 1 : index
      %79 = memref.load %arg7[%c0_44, %c1_45] : memref<1x3xf32, #tpu.memory_space<smem>>
      memref.store %cst_43, %arg7[%c0_44, %c1_45] : memref<1x3xf32, #tpu.memory_space<smem>>
      %cst_46 = arith.constant 0.000000e+00 : f32
      %c0_47 = arith.constant 0 : index
      %c2_48 = arith.constant 2 : index
      %80 = memref.load %arg7[%c0_47, %c2_48] : memref<1x3xf32, #tpu.memory_space<smem>>
      memref.store %cst_46, %arg7[%c0_47, %c2_48] : memref<1x3xf32, #tpu.memory_space<smem>>
    } else {
    }
    %c0 = arith.constant 0 : index
    %c0_1 = arith.constant 0 : index
    %3 = vector.load %arg5[%c0, %c0_1] : memref<8x256xf32, #tpu.memory_space<vmem>>, vector<8x256xf32>
    %c0_2 = arith.constant 0 : index
    %c0_3 = arith.constant 0 : index
    %4 = vector.load %arg1[%c0_2, %c0_3] : memref<32x256xf32, #tpu.memory_space<vmem>>, vector<32x256xf32>
    %c0_4 = arith.constant 0 : index
    %c0_5 = arith.constant 0 : index
    %5 = vector.load %arg3[%c0_4, %c0_5] : memref<32x8xf32, #tpu.memory_space<vmem>>, vector<32x8xf32>
    %cst = arith.constant dense<0.000000e+00> : vector<32x256xf32>
    %6 = tpu.matmul %5, %3, %cst {dimension_numbers = #tpu.dot_dimension_numbers<[1], [0], [0], [1], [0, 0, 1, 1], [], []>} : vector<32x8xf32>, vector<8x256xf32>, vector<32x256xf32> -> vector<32x256xf32>
    %7 = arith.subf %4, %6 : vector<32x256xf32>
    %c0_6 = arith.constant 0 : index
    %c0_7 = arith.constant 0 : index
    %8 = memref.load %arg7[%c0_6, %c0_7] : memref<1x3xf32, #tpu.memory_space<smem>>
    %9 = arith.mulf %7, %7 : vector<32x256xf32>
    %10 = vector.shape_cast %9 : vector<32x256xf32> to vector<1x32x256xf32>
    %cst_8 = arith.constant dense<0.000000e+00> : vector<1xf32>
    %11 = vector.multi_reduction <add>, %10, %cst_8 [1, 2] : vector<1x32x256xf32> to vector<1xf32>
    %12 = vector.shape_cast %11 : vector<1xf32> to vector<1x1x1xf32>
    %13 = vector.extract %12[0, 0, 0] : f32 from vector<1x1x1xf32>
    %14 = arith.addf %8, %13 : f32
    %c0_9 = arith.constant 0 : index
    %c0_10 = arith.constant 0 : index
    %15 = memref.load %arg7[%c0_9, %c0_10] : memref<1x3xf32, #tpu.memory_space<smem>>
    memref.store %14, %arg7[%c0_9, %c0_10] : memref<1x3xf32, #tpu.memory_space<smem>>
    %c0_11 = arith.constant 0 : index
    %c0_12 = arith.constant 0 : index
    %16 = vector.load %arg2[%c0_11, %c0_12] : memref<32x256xf32, #tpu.memory_space<vmem>>, vector<32x256xf32>
    %c0_13 = arith.constant 0 : index
    %c0_14 = arith.constant 0 : index
    %17 = vector.load %arg4[%c0_13, %c0_14] : memref<32x8xf32, #tpu.memory_space<vmem>>, vector<32x8xf32>
    %cst_15 = arith.constant dense<0.000000e+00> : vector<32x256xf32>
    %18 = tpu.matmul %17, %3, %cst_15 {dimension_numbers = #tpu.dot_dimension_numbers<[1], [0], [0], [1], [0, 0, 1, 1], [], []>} : vector<32x8xf32>, vector<8x256xf32>, vector<32x256xf32> -> vector<32x256xf32>
    %19 = arith.subf %16, %18 : vector<32x256xf32>
    %c0_16 = arith.constant 0 : index
    %c1 = arith.constant 1 : index
    %20 = memref.load %arg7[%c0_16, %c1] : memref<1x3xf32, #tpu.memory_space<smem>>
    %21 = arith.mulf %19, %19 : vector<32x256xf32>
    %22 = vector.shape_cast %21 : vector<32x256xf32> to vector<1x32x256xf32>
    %cst_17 = arith.constant dense<0.000000e+00> : vector<1xf32>
    %23 = vector.multi_reduction <add>, %22, %cst_17 [1, 2] : vector<1x32x256xf32> to vector<1xf32>
    %24 = vector.shape_cast %23 : vector<1xf32> to vector<1x1x1xf32>
    %25 = vector.extract %24[0, 0, 0] : f32 from vector<1x1x1xf32>
    %26 = arith.addf %20, %25 : f32
    %c0_18 = arith.constant 0 : index
    %c1_19 = arith.constant 1 : index
    %27 = memref.load %arg7[%c0_18, %c1_19] : memref<1x3xf32, #tpu.memory_space<smem>>
    memref.store %26, %arg7[%c0_18, %c1_19] : memref<1x3xf32, #tpu.memory_space<smem>>
    %28 = tpu.iota {dimensions = array<i32: 1>} : vector<8x256xi32>
    %c0_20 = arith.constant 0 : index
    %c0_21 = arith.constant 0 : index
    %29 = vector.load %arg6[%c0_20, %c0_21] : memref<1x256xi32, #tpu.memory_space<vmem>>, vector<1x256xi32>
    %30 = vector.shape_cast %29 : vector<1x256xi32> to vector<1x256xi32>
    %31 = vector.broadcast %30 : vector<1x256xi32> to vector<8x256xi32>
    %c1_i32 = arith.constant 1 : i32
    %32 = tpu.dynamic_rotate %28 by %c1_i32 dim 1 : vector<8x256xi32>, i32 -> vector<8x256xi32>
    %c1_i32_22 = arith.constant 1 : i32
    %33 = tpu.dynamic_rotate %31 by %c1_i32_22 dim 1 : vector<8x256xi32>, i32 -> vector<8x256xi32>
    %c1_i32_23 = arith.constant 1 : i32
    %34 = tpu.dynamic_rotate %3 by %c1_i32_23 dim 1 : vector<8x256xf32>, i32 -> vector<8x256xf32>
    %35 = arith.subf %3, %34 : vector<8x256xf32>
    %36 = arith.subi %28, %32 : vector<8x256xi32>
    %37 = math.absi %36 : vector<8x256xi32>
    %c1_i32_24 = arith.constant 1 : i32
    %38 = vector.broadcast %c1_i32_24 : i32 to vector<8x256xi32>
    %39 = arith.cmpi eq, %37, %38 : vector<8x256xi32>
    %40 = arith.cmpi eq, %31, %33 : vector<8x256xi32>
    %41 = arith.andi %39, %40 : vector<8x256xi1>
    %42 = arith.mulf %35, %35 : vector<8x256xf32>
    %cst_25 = arith.constant 0.000000e+00 : f32
    %43 = vector.broadcast %cst_25 : f32 to vector<8x256xf32>
    %44 = arith.select %41, %42, %43 : vector<8x256xi1>, vector<8x256xf32>
    %45 = vector.shape_cast %44 : vector<8x256xf32> to vector<1x8x256xf32>
    %cst_26 = arith.constant dense<0.000000e+00> : vector<1xf32>
    %46 = vector.multi_reduction <add>, %45, %cst_26 [1, 2] : vector<1x8x256xf32> to vector<1xf32>
    %47 = vector.shape_cast %46 : vector<1xf32> to vector<1x1x1xf32>
    %48 = vector.extract %47[0, 0, 0] : f32 from vector<1x1x1xf32>
    %c16_i32 = arith.constant 16 : i32
    %49 = tpu.dynamic_rotate %28 by %c16_i32 dim 1 : vector<8x256xi32>, i32 -> vector<8x256xi32>
    %c16_i32_27 = arith.constant 16 : i32
    %50 = tpu.dynamic_rotate %31 by %c16_i32_27 dim 1 : vector<8x256xi32>, i32 -> vector<8x256xi32>
    %c16_i32_28 = arith.constant 16 : i32
    %51 = tpu.dynamic_rotate %3 by %c16_i32_28 dim 1 : vector<8x256xf32>, i32 -> vector<8x256xf32>
    %52 = arith.subf %3, %51 : vector<8x256xf32>
    %53 = arith.subi %28, %49 : vector<8x256xi32>
    %54 = math.absi %53 : vector<8x256xi32>
    %c16_i32_29 = arith.constant 16 : i32
    %55 = vector.broadcast %c16_i32_29 : i32 to vector<8x256xi32>
    %56 = arith.cmpi eq, %54, %55 : vector<8x256xi32>
    %57 = arith.subi %31, %50 : vector<8x256xi32>
    %58 = math.absi %57 : vector<8x256xi32>
    %c1_i32_30 = arith.constant 1 : i32
    %59 = vector.broadcast %c1_i32_30 : i32 to vector<8x256xi32>
    %60 = arith.cmpi eq, %58, %59 : vector<8x256xi32>
    %61 = arith.andi %56, %60 : vector<8x256xi1>
    %62 = arith.mulf %52, %52 : vector<8x256xf32>
    %cst_31 = arith.constant 0.000000e+00 : f32
    %63 = vector.broadcast %cst_31 : f32 to vector<8x256xf32>
    %64 = arith.select %61, %62, %63 : vector<8x256xi1>, vector<8x256xf32>
    %65 = vector.shape_cast %64 : vector<8x256xf32> to vector<1x8x256xf32>
    %cst_32 = arith.constant dense<0.000000e+00> : vector<1xf32>
    %66 = vector.multi_reduction <add>, %65, %cst_32 [1, 2] : vector<1x8x256xf32> to vector<1xf32>
    %67 = vector.shape_cast %66 : vector<1xf32> to vector<1x1x1xf32>
    %68 = vector.extract %67[0, 0, 0] : f32 from vector<1x1x1xf32>
    %69 = arith.addf %48, %68 : f32
    %c0_33 = arith.constant 0 : index
    %c2 = arith.constant 2 : index
    %70 = memref.load %arg7[%c0_33, %c2] : memref<1x3xf32, #tpu.memory_space<smem>>
    %71 = arith.addf %70, %69 : f32
    %c0_34 = arith.constant 0 : index
    %c2_35 = arith.constant 2 : index
    %72 = memref.load %arg7[%c0_34, %c2_35] : memref<1x3xf32, #tpu.memory_space<smem>>
    memref.store %71, %arg7[%c0_34, %c2_35] : memref<1x3xf32, #tpu.memory_space<smem>>
    %c0_i32_36 = arith.constant 0 : i32
    %73 = arith.cmpi sgt, %arg0, %c0_i32_36 : i32
    %74 = arith.extui %73 : i1 to i32
    %c0_i32_37 = arith.constant 0 : i32
    %75 = arith.cmpi ne, %74, %c0_i32_37 : i32
    scf.if %75 {
      %c0_40 = arith.constant 0 : index
      %c0_41 = arith.constant 0 : index
      %78 = vector.load %arg8[%c0_40, %c0_41] : memref<8x16xf32, #tpu.memory_space<vmem>>, vector<8x16xf32>
      %79 = vector.extract_strided_slice %3 {offsets = [0, 0], sizes = [8, 16], strides = [1, 1]} : vector<8x256xf32> to vector<8x16xf32>
      %80 = arith.subf %78, %79 : vector<8x16xf32>
      %c0_42 = arith.constant 0 : index
      %c2_43 = arith.constant 2 : index
      %81 = memref.load %arg7[%c0_42, %c2_43] : memref<1x3xf32, #tpu.memory_space<smem>>
      %82 = arith.mulf %80, %80 : vector<8x16xf32>
      %83 = vector.shape_cast %82 : vector<8x16xf32> to vector<1x8x16xf32>
      %cst_44 = arith.constant dense<0.000000e+00> : vector<1xf32>
      %84 = vector.multi_reduction <add>, %83, %cst_44 [1, 2] : vector<1x8x16xf32> to vector<1xf32>
      %85 = vector.shape_cast %84 : vector<1xf32> to vector<1x1x1xf32>
      %86 = vector.extract %85[0, 0, 0] : f32 from vector<1x1x1xf32>
      %87 = arith.addf %81, %86 : f32
      %c0_45 = arith.constant 0 : index
      %c2_46 = arith.constant 2 : index
      %88 = memref.load %arg7[%c0_45, %c2_46] : memref<1x3xf32, #tpu.memory_space<smem>>
      memref.store %87, %arg7[%c0_45, %c2_46] : memref<1x3xf32, #tpu.memory_space<smem>>
    } else {
    }
    %76 = vector.extract_strided_slice %3 {offsets = [0, 240], sizes = [8, 16], strides = [1, 1]} : vector<8x256xf32> to vector<8x16xf32>
    %c0_38 = arith.constant 0 : index
    %c0_39 = arith.constant 0 : index
    %77 = vector.load %arg8[%c0_38, %c0_39] : memref<8x16xf32, #tpu.memory_space<vmem>>, vector<8x16xf32>
    tpu.vector_store %arg8[%c0_38, %c0_39], %76 {strides = array<i32>} : memref<8x16xf32, #tpu.memory_space<vmem>>, vector<8x16xf32>,
    return
  }
  func.func @transform_0(%arg0: i32) -> (i32, i32) {
    %c0_i32 = arith.constant 0 : i32
    %c0_i32_0 = arith.constant 0 : i32
    return %c0_i32, %arg0 : i32, i32
  }
  func.func @transform_1(%arg0: i32) -> (i32, i32) {
    %c0_i32 = arith.constant 0 : i32
    %c0_i32_0 = arith.constant 0 : i32
    return %c0_i32, %arg0 : i32, i32
  }
  func.func @transform_2(%arg0: i32) -> (i32, i32) {
    %c0_i32 = arith.constant 0 : i32
    %c0_i32_0 = arith.constant 0 : i32
    %c0_i32_1 = arith.constant 0 : i32
    return %c0_i32, %c0_i32_0 : i32, i32
  }
  func.func @transform_3(%arg0: i32) -> (i32, i32) {
    %c0_i32 = arith.constant 0 : i32
    %c0_i32_0 = arith.constant 0 : i32
    %c0_i32_1 = arith.constant 0 : i32
    return %c0_i32, %c0_i32_0 : i32, i32
  }
  func.func @transform_4(%arg0: i32) -> (i32, i32) {
    %c0_i32 = arith.constant 0 : i32
    %c0_i32_0 = arith.constant 0 : i32
    return %c0_i32, %arg0 : i32, i32
  }
  func.func @transform_5(%arg0: i32) -> (i32, i32) {
    %c0_i32 = arith.constant 0 : i32
    %c0_i32_0 = arith.constant 0 : i32
    %c0_i32_1 = arith.constant 0 : i32
    return %c0_i32, %c0_i32_0 : i32, i32
  }
  func.func @transform_6(%arg0: i32) -> (i32, i32) {
    %c0_i32 = arith.constant 0 : i32
    %c0_i32_0 = arith.constant 0 : i32
    %c0_i32_1 = arith.constant 0 : i32
    return %c0_i32, %c0_i32_0 : i32, i32
  }
}

</mosaic_0001>

<bundles_post_ra>
// kernel: net_forward.1
= control target key start
LH: loop header
LB: loop body
LE: loop exit
PB: predicated region body
PF: predicated region fallthrough
CT: control target
= control target key end

     0   :  { %11 = vsyncpa [#allocation4], 0  ;;  %s829_s0 = inlined_call_operand.vmem [shape: f32[32,256], index: 0, kind: input, shape index: {}]   ;;  %s830_s1 = inlined_call_operand.hbm [shape: f32[32,256], index: 1, kind: input, shape index: {}]   ;;  %s831_s2 = inlined_call_operand.vmem [shape: f32[32,8], index: 2, kind: input, shape index: {}]   ;;  %s832_s3 = inlined_call_operand.vmem [shape: f32[32,8], index: 3, kind: input, shape index: {}]   ;;  %s833_s4 = inlined_call_operand.vmem [shape: f32[8,256], index: 4, kind: input, shape index: {}]   ;;  %s834_s5 = inlined_call_operand.vmem [shape: s32[1,256], index: 5, kind: input, shape index: {}]   ;;  %s835_s6 = inlined_call_operand.vmem [shape: f32[1,3], index: 6, kind: output, shape index: {}]  }
   0x1   :  { %12 = vsyncpa [#allocation5], 0  ;;  %s585_s21 = smov [#allocation3]   ;;  %s547_s25 = scalar_lea.hbm %s830_s1, 1024 }
   0x2   :  { %s20_s22 = sshll.u32 %s585_s21, 4  ;;  %p548_p0 = scmp.ne.s32.totalorder %s830_s1, %s547_s25  ;;  %s21_s22 = int_to_ptr.vmem [resolvable:$true] %s20_s22 }
   0x3   :  { %p551_p1 = scmp.lt.u32.totalorder %s547_s25, %s830_s1 }
   0x5   :  { %p553_p2 = pnand %p551_p1, %p548_p0 }
   0x7   :  { %556 = shalt.err (!%p553_p2)
}
   0x8   :  { %s557_s30 = scalar_lea.vmem %s21_s22, 1024  ;;  %p562_p4 = scmp.lt.s32.totalorder %s21_s22, %s21_s22 }
   0x9   :  { %p558_p3 = scmp.ne.s32.totalorder %s21_s22, %s557_s30  ;;  %p563_p5 = scmp.lt.s32.totalorder %s557_s30, %s557_s30 }
   0xb   :  { %p564_p6 = por %p563_p5, %p562_p4 }
   0xd   :  { %p565_p7 = pnand %p564_p6, %p558_p3 }
   0xf   :  { %568 = shalt.err (!%p565_p7)
}
  0x10   :  { %s586_s7 = smov 256   ;;  %s587_s8 = smov 16  }
  0x11   :  { %26 = dma.hbm_to_vmem [thread:$0]  %s830_s1, 1024, %s21_s22, [#allocation4], %s586_s7, %s586_s7, %s587_s8  }
  0x12   :  { %581 = dma.done.wait [#allocation4], 1024  }
  0x13   :  { %582 = vsyncadd [#allocation4], 4294966272  ;;  %v349_v0 = vlaneseq  ;;  %v588_v1 = vmov 0.0   ;;  %s589_s11 = smov 1   ;;  %v648_v4 = vld [vmem:[%s833_s4 + $0x8] sm:$0xff]  ;;  %v653_v5 = vld [vmem:[%s833_s4] sm:$0xff] }
  0x14   :  { %139 = vmatprep.mubr.f32.mxu0 %v588_v1  ;;  %288 = vmatprep.mubr.f32.mxu1 %v588_v1  ;;  %v58_v6 = vld [vmem:[%s831_s2] sm:$0xff]  ;;  %vm62_vm0 = vcmask 64512   ;;  %v59_v12 = vld [vmem:[%s831_s2 + $0x8] sm:$0xff]  ;;  %v60_v16 = vld [vmem:[%s831_s2 + $0x10] sm:$0xff] }
  0x15   :  { %v639_v2 = vand.u32 127, %v349_v0  ;;  %v354_v3 = vshrl.u32 %v349_v0, 7  ;;  %75 = vmatprep.subr.mxu0 %v648_v4  ;;  %224 = vmatprep.subr.mxu1 %v648_v4  ;;  %v208_v7 = vld [vmem:[%s832_s3] sm:$0xff]  ;;  %v209_v13 = vld [vmem:[%s832_s3 + $0x8] sm:$0xff]  ;;  %v210_v17 = vld [vmem:[%s832_s3 + $0x10] sm:$0xff] }
  0x16   :  { %76 = vmatpush1.msra.mxu0 %v653_v5  ;;  %225 = vmatpush1.msra.mxu1 %v653_v5  ;;  %v352_v11 = vld [vmem:[%s834_s5] sm:$0x3]  ;;  %v61_v18 = vld [vmem:[%s831_s2 + $0x18] sm:$0xff]  ;;  %v51_v47 = vld [vmem:[%s829_s0 + $0x8] sm:$0xff]  ;;  %s505_s5 = sshll.u32 %s835_s6, 4  ;;  %s506_s5 = int_to_ptr.vmem [resolvable:$true] %s505_s5 }
  0x17   :  { %410 = vrot.lane.b32.xlu1 %v639_v2, %s587_s8  ;;  %361 = vrot.lane.b32.xlu0 %v639_v2, %s589_s11  ;;  %v351_v8 = vadd.s32 128, %v639_v2  ;;  %v359_v9 = vsub.s32 1, %v354_v3  ;;  %v355_v10 = vsub.s32 0, %v354_v3  ;;  %v211_v19 = vld [vmem:[%s832_s3 + $0x18] sm:$0xff]  ;;  %vm414_vm1 = vcmp.lt.s32.totalorder %v639_v2, 16  ;;  %v50_v43 = vld [vmem:[%s829_s0] sm:$0xff]  ;;  %p574_p9 = scmp.lt.s32.totalorder %s506_s5, %s506_s5 }
  0x18   :  { %515 = vmatmul.mubr.msk.f32.vlgmr.msra.gmra.mrb[0].mxu0 %vm62_vm0, %v58_v6  ;;  %519 = vmatmul.mubr.msk.f32.vlgmr.msra.gmra.mrb[0].mxu1 %vm62_vm0, %v208_v7  ;;  %vm365_vm2 = vcmp.lt.s32.totalorder %v639_v2, 1  ;;  %v200_v44 = vld [vmem:[#allocation3] sm:$0xff]  ;;  %v201_v48 = vld [vmem:[#allocation3 + $0x8] sm:$0xff]  ;;  %v52_v63 = vld [vmem:[%s829_s0 + $0x10] sm:$0xff]  ;;  %s569_s25 = scalar_lea.vmem %s506_s5, 16 }
  0x19   :  { %145 = vmatprep.mubr.f32.mxu0 %v588_v1  ;;  %294 = vmatprep.mubr.f32.mxu1 %v588_v1  ;;  %v679_v14 = vrot.slane %v352_v11, %v359_v9  ;;  %v681_v15 = vrot.slane %v352_v11, %v355_v10  ;;  %v202_v0 = vld [vmem:[#allocation3 + $0x10] sm:$0xff]  ;;  %v53_v10 = vld [vmem:[%s829_s0 + $0x18] sm:$0xff]  ;;  %p570_p8 = scmp.ne.s32.totalorder %s506_s5, %s569_s25  ;;  %p575_p10 = scmp.lt.s32.totalorder %s569_s25, %s569_s25 }
  0x1a   :  { %v203_v11 = vld [vmem:[#allocation3 + $0x18] sm:$0xff] }
  0x1b   :  { %412 = vrot.lane.b32.xlu1 %v351_v8, %s587_s8  ;;  %363 = vrot.lane.b32.xlu0 %v351_v8, %s589_s11  ;;  %p576_p11 = por %p575_p10, %p574_p9 }
  0x1c   :  { %516 = vmatmul.mubr.msk.f32.gmra.mrb[2].mxu0 %vm62_vm0, %v59_v12  ;;  %520 = vmatmul.mubr.msk.f32.gmra.mrb[2].mxu1 %vm62_vm0, %v209_v13 }
  0x1d   :  { %151 = vmatprep.mubr.f32.mxu0 %v588_v1  ;;  %300 = vmatprep.mubr.f32.mxu1 %v588_v1  ;;  %p577_p12 = pnand %p576_p11, %p570_p8 }
  0x1f   :  { %419 = vrot.lane.b32.xlu1 %v679_v14, %s587_s8  ;;  %417 = vrot.lane.b32.xlu0 %v681_v15, %s587_s8 }
  0x20   :  { %517 = vmatmul.mubr.msk.f32.gmra.mrb[4].mxu0 %vm62_vm0, %v60_v16  ;;  %521 = vmatmul.mubr.msk.f32.gmra.mrb[4].mxu1 %vm62_vm0, %v210_v17 }
  0x21   :  { %157 = vmatprep.mubr.f32.mxu0 %v588_v1  ;;  %306 = vmatprep.mubr.f32.mxu1 %v588_v1 }
  0x23   :  { %376 = vrot.lane.b32.xlu1 %v648_v4, %s589_s11  ;;  %374 = vrot.lane.b32.xlu0 %v653_v5, %s589_s11 }
  0x24   :  { %518 = vmatmul.mubr.msk.f32.gmra.mrb[6].mxu0 %vm62_vm0, %v61_v18  ;;  %522 = vmatmul.mubr.msk.f32.gmra.mrb[6].mxu1 %vm62_vm0, %v211_v19 }
  0x27   :  { %425 = vrot.lane.b32.xlu1 %v648_v4, %s587_s8  ;;  %423 = vrot.lane.b32.xlu0 %v653_v5, %s587_s8 }
  0x2b   :  { %370 = vrot.lane.b32.xlu1 %v679_v14, %s589_s11  ;;  %368 = vrot.lane.b32.xlu0 %v681_v15, %s589_s11 }
  0x89   :  { %v411_v20 = vpop.permute.xlu1 %410  ;;  %v362_v21 = vpop.permute.xlu0 %361 }
  0x8d   :  { %v413_v22 = vpop.permute.xlu1 %412  ;;  %v364_v23 = vpop.permute.xlu0 %363 }
  0x8e   :  { %v416_v26 = vsel %vm414_vm1, %v413_v22, %v411_v20  ;;  %v367_v27 = vsel %vm365_vm2, %v364_v23, %v362_v21  ;;  %v366_v28 = vsel %vm365_vm2, %v362_v21, %v364_v23  ;;  %v415_v32 = vsel %vm414_vm1, %v411_v20, %v413_v22 }
  0x8f   :  { %v431_v31 = vsub.s32 %v639_v2, %v416_v26  ;;  %v382_v33 = vsub.s32 %v639_v2, %v367_v27  ;;  %v383_v34 = vsub.s32 %v351_v8, %v366_v28  ;;  %v432_v35 = vsub.s32 %v351_v8, %v415_v32 }
  0x91   :  { %v420_v24 = vpop.permute.xlu1 %419  ;;  %v418_v25 = vpop.permute.xlu0 %417  ;;  %v434_v36 = vsub.s32 0, %v431_v31  ;;  %v385_v39 = vsub.s32 0, %v382_v33  ;;  %v388_v42 = vsub.s32 0, %v383_v34  ;;  %v437_v50 = vsub.s32 0, %v432_v35 }
  0x92   :  { %v421_v37 = vsel %vm414_vm1, %v418_v25, %v420_v24  ;;  %v422_v38 = vsel %vm414_vm1, %v420_v24, %v418_v25 }
  0x93   :  { %v441_v45 = vsub.s32 %v681_v15, %v422_v38  ;;  %v442_v46 = vsub.s32 %v679_v14, %v421_v37  ;;  %v745_v49 = vmin.u32 %v434_v36, %v431_v31  ;;  %v747_v53 = vmin.u32 %v385_v39, %v382_v33  ;;  %v205_v36 = vld [vmem:[#allocation3 + $0x28] sm:$0xff] }
  0x94   :  { %v751_v59 = vmin.u32 %v388_v42, %v383_v34  ;;  %v761_v12 = vmin.u32 %v437_v50, %v432_v35  ;;  %v55_v35 = vld [vmem:[%s829_s0 + $0x28] sm:$0xff] }
  0x95   :  { %v377_v29 = vpop.permute.xlu1 %376  ;;  %v375_v30 = vpop.permute.xlu0 %374  ;;  %v444_v1 = vsub.s32 0, %v441_v45  ;;  %v447_v3 = vsub.s32 0, %v442_v46  ;;  %vm390_vm3 = vcmp.eq.s32.totalorder %v747_v53, 1  ;;  %vm439_vm9 = vcmp.eq.s32.totalorder %v745_v49, 16 }
  0x96   :  { %v379_v54 = vsel %vm365_vm2, %v377_v29, %v375_v30  ;;  %v378_v60 = vsel %vm365_vm2, %v375_v30, %v377_v29  ;;  %v54_v29 = vld [vmem:[%s829_s0 + $0x20] sm:$0xff]  ;;  %vm391_vm4 = vcmp.eq.s32.totalorder %v751_v59, 1  ;;  %vm440_vm11 = vcmp.eq.s32.totalorder %v761_v12, 16 }
  0x97   :  { %v380_v13 = vsub.f32 %v653_v5, %v379_v54  ;;  %v381_v20 = vsub.f32 %v648_v4, %v378_v60  ;;  %v204_v30 = vld [vmem:[#allocation3 + $0x20] sm:$0xff]  ;;  %v770_v31 = vmin.u32 %v444_v1, %v441_v45  ;;  %v772_v32 = vmin.u32 %v447_v3, %v442_v46  ;;  %v207_v1 = vld [vmem:[#allocation3 + $0x38] sm:$0xff] }
  0x99   :  { %v733_v40 = vpop.permute.xlu1 %425  ;;  %v735_v41 = vpop.permute.xlu0 %423  ;;  %v777_v37 = vmul.f32 %v380_v13, %v380_v13  ;;  %vm449_vm10 = vcmp.eq.s32.totalorder %v770_v31, 1  ;;  %vm450_vm12 = vcmp.eq.s32.totalorder %v772_v32, 1 }
  0x9a   :  { %v428_v3 = vsel %vm414_vm1, %v733_v40, %v735_v41  ;;  %vm451_vm13 = vmand %vm439_vm9, %vm449_vm10 }
  0x9b   :  { %vm452_vm14 = vmand %vm440_vm11, %vm450_vm12 }
  0x9d   :  { %v371_v8 = vpop.permute.xlu1 %370  ;;  %v369_v9 = vpop.permute.xlu0 %368 }
  0x9e   :  { %v373_v38 = vsel %vm365_vm2, %v371_v8, %v369_v9  ;;  %v372_v54 = vsel %vm365_vm2, %v369_v9, %v371_v8 }
  0x9f   :  { %vm392_vm5 = vcmp.eq.s32.totalorder %v681_v15, %v373_v38  ;;  %vm393_vm6 = vcmp.eq.s32.totalorder %v679_v14, %v372_v54 }
  0xa0   :  { %vm805_vm7 = vmand %vm390_vm3, %vm392_vm5 }
  0xa1   :  { %vm811_vm8 = vmand %vm391_vm4, %vm393_vm6  ;;  %v398_v59 = vsel %vm805_vm7, %v777_v37, 0.0 }
  0xeb   :  { %v141_v51 = vpop.f32.mrb[0].mxu0  ;;  %v290_v52 = vpop.f32.mrb[0].mxu1 }
  0xec   :  { %v164_v55 = vsub.f32 %v50_v43, %v141_v51  ;;  %v143_v56 = vpop.f32.mrb[1].mxu0  ;;  %v313_v57 = vsub.f32 %v200_v44, %v290_v52  ;;  %v292_v58 = vpop.f32.mrb[1].mxu1  ;;  %v427_v52 = vsel %vm414_vm1, %v735_v41, %v733_v40 }
  0xed   :  { %v165_v61 = vsub.f32 %v51_v47, %v143_v56  ;;  %v314_v62 = vsub.f32 %v201_v48, %v292_v58  ;;  %v206_v58 = vld [vmem:[#allocation3 + $0x30] sm:$0xff] }
  0xee   :  { %v173_v6 = vmul.f32 %v164_v55, %v164_v55  ;;  %v322_v7 = vmul.f32 %v313_v57, %v313_v57  ;;  %v56_v57 = vld [vmem:[%s829_s0 + $0x30] sm:$0xff] }
  0xef   :  { %v174_v16 = vmul.f32 %v165_v61, %v165_v61  ;;  %v323_v17 = vmul.f32 %v314_v62, %v314_v62  ;;  %v147_v18 = vpop.f32.mrb[2].mxu0  ;;  %v296_v19 = vpop.f32.mrb[2].mxu1 }
  0xf0   :  { %v166_v21 = vsub.f32 %v52_v63, %v147_v18  ;;  %v315_v22 = vsub.f32 %v202_v0, %v296_v19  ;;  %v149_v23 = vpop.f32.mrb[3].mxu0  ;;  %v298_v24 = vpop.f32.mrb[3].mxu1  ;;  %v57_v0 = vld [vmem:[%s829_s0 + $0x38] sm:$0xff]  ;;  %v397_v19 = vmul.f32 %v381_v20, %v381_v20 }
  0xf1   :  { %v181_v25 = vadd.f32 %v174_v16, %v173_v6  ;;  %v330_v26 = vadd.f32 %v323_v17, %v322_v7  ;;  %v167_v27 = vsub.f32 %v53_v10, %v149_v23  ;;  %v316_v28 = vsub.f32 %v203_v11, %v298_v24 }
  0xf2   :  { %v175_v33 = vmul.f32 %v166_v21, %v166_v21  ;;  %v324_v34 = vmul.f32 %v315_v22, %v315_v22  ;;  %v429_v24 = vsub.f32 %v653_v5, %v428_v3 }
  0xf3   :  { %v176_v39 = vmul.f32 %v167_v27, %v167_v27  ;;  %v325_v42 = vmul.f32 %v316_v28, %v316_v28  ;;  %v153_v43 = vpop.f32.mrb[4].mxu0  ;;  %v302_v44 = vpop.f32.mrb[4].mxu1 }
  0xf4   :  { %v182_v45 = vadd.f32 %v181_v25, %v175_v33  ;;  %v331_v47 = vadd.f32 %v330_v26, %v324_v34  ;;  %v168_v46 = vsub.f32 %v54_v29, %v153_v43  ;;  %v317_v48 = vsub.f32 %v204_v30, %v302_v44  ;;  %v155_v50 = vpop.f32.mrb[5].mxu0  ;;  %v304_v51 = vpop.f32.mrb[5].mxu1 }
  0xf5   :  { %v169_v55 = vsub.f32 %v55_v35, %v155_v50  ;;  %v318_v56 = vsub.f32 %v205_v36, %v304_v51  ;;  %v430_v25 = vsub.f32 %v648_v4, %v427_v52  ;;  %v453_v53 = vmul.f32 %v429_v24, %v429_v24 }
  0xf6   :  { %v183_v60 = vadd.f32 %v182_v45, %v176_v39  ;;  %v332_v61 = vadd.f32 %v331_v47, %v325_v42  ;;  %v177_v62 = vmul.f32 %v168_v46, %v168_v46  ;;  %v326_v63 = vmul.f32 %v317_v48, %v317_v48 }
  0xf7   :  { %v178_v6 = vmul.f32 %v169_v55, %v169_v55  ;;  %v327_v7 = vmul.f32 %v318_v56, %v318_v56  ;;  %v159_v8 = vpop.f32.mrb[6].mxu0  ;;  %v308_v9 = vpop.f32.mrb[6].mxu1  ;;  %v454_v30 = vmul.f32 %v430_v25, %v430_v25  ;;  %v399_v33 = vsel %vm811_vm8, %v397_v19, 0.0 }
  0xf8   :  { %v184_v10 = vadd.f32 %v183_v60, %v177_v62  ;;  %v333_v11 = vadd.f32 %v332_v61, %v326_v63  ;;  %v170_v13 = vsub.f32 %v56_v57, %v159_v8  ;;  %v319_v16 = vsub.f32 %v206_v58, %v308_v9  ;;  %v161_v17 = vpop.f32.mrb[7].mxu0  ;;  %v310_v18 = vpop.f32.mrb[7].mxu1 }
  0xf9   :  { %v171_v21 = vsub.f32 %v57_v0, %v161_v17  ;;  %v320_v22 = vsub.f32 %v207_v1, %v310_v18  ;;  %v400_v49 = vadd.f32 %v399_v33, %v398_v59  ;;  %v455_v31 = vsel %vm451_vm13, %v453_v53, 0.0 }
  0xfa   :  { %v185_v23 = vadd.f32 %v184_v10, %v178_v6  ;;  %v334_v2 = vadd.f32 %v333_v11, %v327_v7  ;;  %v179_v40 = vmul.f32 %v170_v13, %v170_v13  ;;  %v328_v41 = vmul.f32 %v319_v16, %v319_v16 }
  0xfb   :  { %v180_v26 = vmul.f32 %v171_v21, %v171_v21  ;;  %v329_v27 = vmul.f32 %v320_v22, %v320_v22  ;;  %v456_v12 = vsel %vm452_vm14, %v454_v30, 0.0 }
  0xfc   :  { %v186_v14 = vadd.f32 %v185_v23, %v179_v40  ;;  %v335_v28 = vadd.f32 %v334_v2, %v328_v41  ;;  %v457_v32 = vadd.f32 %v456_v12, %v455_v31 }
  0xfe   :  { %v336_v5 = vadd.f32 %v335_v28, %v329_v27  ;;  %v187_v15 = vadd.f32 %v186_v14, %v180_v26 }
 0x100   :  { %337 = vadd.xlane.f32.xlu1 %v336_v5  ;;  %188 = vadd.xlane.f32.xlu0 %v187_v15 }
 0x104   :  { %401 = vadd.xlane.f32.xlu0 %v400_v49 }
 0x108   :  { %458 = vadd.xlane.f32.xlu0 %v457_v32 }
 0x111   :  { %494 = vrot.lane.b32.xlu1 %v648_v4, %s587_s8 }
 0x18d   :  { %v338_v34 = vpop.xlane.xlu1 %337  ;;  %v189_v35 = vpop.xlane.xlu0 %188 }
 0x18e   :  { %v339_v36 = vrot.slane %v338_v34, 4  ;;  %v190_v37 = vrot.slane %v189_v35, 4 }
 0x190   :  { %v340_v38 = vadd.f32 %v339_v36, %v338_v34  ;;  %v191_v39 = vadd.f32 %v190_v37, %v189_v35 }
 0x191   :  { %v402_v42 = vpop.xlane.xlu0 %401  ;;  %v495_v43 = vpop.permute.xlu1 %494 }
 0x192   :  { %v341_v44 = vrot.slane %v340_v38, 2  ;;  %v192_v45 = vrot.slane %v191_v39, 2  ;;  %v403_v47 = vrot.slane %v402_v42, 4 }
 0x194   :  { %v404_v46 = vadd.f32 %v403_v47, %v402_v42  ;;  %v193_v48 = vadd.f32 %v192_v45, %v191_v39  ;;  %v342_v50 = vadd.f32 %v341_v44, %v340_v38 }
 0x195   :  { %v459_v51 = vpop.xlane.xlu0 %458 }
 0x196   :  { %v405_v52 = vrot.slane %v404_v46, 2  ;;  %v460_v54 = vrot.slane %v459_v51, 4  ;;  %v194_v55 = vrot.slane %v193_v48, 1  ;;  %v343_v56 = vrot.slane %v342_v50, 1 }
 0x198   :  { %v461_v4 = vadd.f32 %v460_v54, %v459_v51  ;;  %v195_v57 = vadd.f32 %v194_v55, %v193_v48  ;;  %v344_v58 = vadd.f32 %v343_v56, %v342_v50  ;;  %v406_v60 = vadd.f32 %v405_v52, %v404_v46 }
 0x19a   :  { %v462_v61 = vrot.slane %v461_v4, 2  ;;  %532 = vpush %v195_v57  ;;  %v407_v62 = vrot.slane %v406_v60, 1 }
 0x19b   :  { %534 = vpush %v344_v58 }
 0x19c   :  { %v463_v63 = vadd.f32 %v462_v61, %v461_v4  ;;  %v408_v0 = vadd.f32 %v407_v62, %v406_v60 }
 0x19e   :  { %536 = vpush %v408_v0  ;;  %v464_v1 = vrot.slane %v463_v63, 1 }
 0x1a0   :  { %v465_v3 = vadd.f32 %v464_v1, %v463_v63 }
 0x1a2   :  { %538 = vpush %v465_v3 }
 0x1cb   :  { %s533_s0 = spop %532 }
 0x1cc   :  { %s535_s8 = spop %534  ;;  %199 = sst [smem:[#allocation6]] %s533_s0 }
 0x1cd   :  { %348 = sst [smem:[#allocation6 + $0x1]] %s535_s8 }
 0x1cf   :  { %s537_s20 = spop %536 }
 0x1d3   :  { %s539_s21 = spop %538 }
 0x1d4   :  { %s467_s24 = sadd.f32 %s539_s21, %s537_s20 }
 0x1d6   :  { %471 = sst [smem:[#allocation6 + $0x2]] %s467_s24 }
 0x1d7   :  { %580 = shalt.err (!%p577_p12)
}
 0x1d8   :  { %s590_s26 = smov [#allocation6]  }
 0x1d9   :  { %508 = dma.smem_to_vmem %s590_s26, 16, %s506_s5, [#allocation5]  }
 0x1da   :  { %583 = dma.done.wait [#allocation5], 16  }
 0x1db   :  { %584 = vsyncadd [#allocation5], 4294967280 }
 0x1dc   :  { %512 = sfence }
 0x1dd   :  { %513 = vsyncpa [#allocation4], 1 }
 0x1de   :  { %514 = vsyncpa [#allocation5], 1 }

</bundles_post_ra>
